<compile_context>
chip_gen: v7x
topology: tpu7x:2x2x1
jax: 0.10.0
libtpu: 0.0.40
codegen_flags: <defaults>
</compile_context>

<pallas_src>
import functools

import jax
import jax.numpy as jnp
from jax.experimental import pallas as pl
from jax.experimental.pallas import tpu as pltpu  # noqa: F401  (TPU backend)

BN_EPS = 1e-5


def _residual_kernel(x_ref, w_ref, b_ref, gamma_ref, beta_ref, out_ref, *, o):
    x = x_ref[...]                                            # (B, i)
    w = w_ref[...]                                            # (i, o)

    # Linear: x @ W^T + b   (W stored pre-transposed -> x @ w), f32 accumulate.
    h = jnp.dot(x, w, preferred_element_type=jnp.float32) + b_ref[...]  # (B, o)

    # BatchNorm1d, training mode: per-feature batch mean / biased variance.
    mean = jnp.mean(h, axis=0, keepdims=True)                 # (1, o)
    d = h - mean                                              # reused below
    var = jnp.mean(d * d, axis=0, keepdims=True)              # biased (1, o)

    # Fold gamma and the 1/std into one per-feature scale; normalize + affine
    # becomes a single full-width multiply-add, then ReLU.
    a = gamma_ref[...] * jax.lax.rsqrt(var + BN_EPS)          # (1, o) narrow
    act = jnp.maximum(d * a + beta_ref[...], 0.0)             # (B, o)

    # Fused concat: one (B, o+i) output slab written from inside the kernel.
    out_ref[:, :o] = act.astype(out_ref.dtype)
    out_ref[:, o:] = x.astype(out_ref.dtype)


def residual_forward(x, w_t, bias, gamma, beta):
    """x: (B, i) f32; w_t: (i, o); bias/gamma/beta: (1, o). Returns (B, o + i)."""
    B, i = x.shape
    o = w_t.shape[1]

    kernel = functools.partial(_residual_kernel, o=o)
    return pl.pallas_call(
        kernel,
        out_shape=jax.ShapeDtypeStruct((B, o + i), x.dtype),
        in_specs=[
            pl.BlockSpec((B, i), lambda: (0, 0)),
            pl.BlockSpec((i, o), lambda: (0, 0)),
            pl.BlockSpec((1, o), lambda: (0, 0)),
            pl.BlockSpec((1, o), lambda: (0, 0)),
            pl.BlockSpec((1, o), lambda: (0, 0)),
        ],
        out_specs=pl.BlockSpec((B, o + i), lambda: (0, 0)),
    )(x, w_t, bias, gamma, beta)


if __name__ == "__main__":
    B, I, O = 8, 32, 32  # small shapes consistent with the module

    key = jax.random.PRNGKey(0)
    kx, kw, kb = jax.random.split(key, 3)

    x = jax.random.normal(kx, (B, I), dtype=jnp.float32)

    # Deterministic parameter init mirroring nn.Linear defaults:
    # W ~ U(-1/sqrt(i), 1/sqrt(i)), b ~ U(-1/sqrt(i), 1/sqrt(i))
    bound = 1.0 / jnp.sqrt(jnp.float32(I))
    w = jax.random.uniform(kw, (O, I), minval=-bound, maxval=bound, dtype=jnp.float32)
    b = jax.random.uniform(kb, (O,), minval=-bound, maxval=bound, dtype=jnp.float32)

    # BatchNorm1d defaults: gamma = 1, beta = 0.
    gamma = jnp.ones((O,), dtype=jnp.float32)
    beta = jnp.zeros((O,), dtype=jnp.float32)

    w_t = w.T                              # (I, O) for the kernel
    bias2d = b.reshape(1, O)
    gamma2d = gamma.reshape(1, O)
    beta2d = beta.reshape(1, O)

    out = residual_forward(x, w_t, bias2d, gamma2d, beta2d)
    out = jax.block_until_ready(out)

    # Reference check in plain JAX (training-mode batchnorm, biased variance).
    h_ref = x @ w.T + b
    mu = h_ref.mean(axis=0, keepdims=True)
    var = ((h_ref - mu) ** 2).mean(axis=0, keepdims=True)
    ref = jnp.maximum((h_ref - mu) / jnp.sqrt(var + BN_EPS) * gamma + beta, 0.0)
    ref = jnp.concatenate([ref, x], axis=1)

    assert out.shape == (B, O + I), out.shape
    assert jnp.allclose(out, ref, atol=1e-4, rtol=1e-4), (
        float(jnp.max(jnp.abs(out - ref)))
    )
    print("KERNEL_OK")
</pallas_src>

<mosaic_0001>
module attributes {stable_mosaic.version = 11 : i64} {
  func.func @_residual_kernel(%arg0: memref<8x32xf32, #tpu.memory_space<vmem>>, %arg1: memref<32x32xf32, #tpu.memory_space<vmem>>, %arg2: memref<1x32xf32, #tpu.memory_space<vmem>>, %arg3: memref<1x32xf32, #tpu.memory_space<vmem>>, %arg4: memref<1x32xf32, #tpu.memory_space<vmem>>, %arg5: memref<8x64xf32, #tpu.memory_space<vmem>>) attributes {dimension_semantics = [], scalar_prefetch = 0 : i64, scratch_operands = 0 : i64, tpu.core_type = #tpu.core_type<tc>} {
    %c0 = arith.constant 0 : index
    %c0_0 = arith.constant 0 : index
    %0 = vector.load %arg0[%c0, %c0_0] : memref<8x32xf32, #tpu.memory_space<vmem>>, vector<8x32xf32>
    %c0_1 = arith.constant 0 : index
    %c0_2 = arith.constant 0 : index
    %1 = vector.load %arg1[%c0_1, %c0_2] : memref<32x32xf32, #tpu.memory_space<vmem>>, vector<32x32xf32>
    %cst = arith.constant dense<0.000000e+00> : vector<8x32xf32>
    %2 = tpu.matmul %0, %1, %cst {dimension_numbers = #tpu.dot_dimension_numbers<[1], [0], [0], [1], [0, 0, 1, 1], [], []>} : vector<8x32xf32>, vector<32x32xf32>, vector<8x32xf32> -> vector<8x32xf32>
    %c0_3 = arith.constant 0 : index
    %c0_4 = arith.constant 0 : index
    %3 = vector.load %arg2[%c0_3, %c0_4] : memref<1x32xf32, #tpu.memory_space<vmem>>, vector<1x32xf32>
    %4 = vector.broadcast %3 : vector<1x32xf32> to vector<8x32xf32>
    %5 = arith.addf %2, %4 : vector<8x32xf32>
    %cst_5 = arith.constant dense<0.000000e+00> : vector<32xf32>
    %6 = vector.multi_reduction <add>, %5, %cst_5 [0] : vector<8x32xf32> to vector<32xf32>
    %7 = vector.shape_cast %6 : vector<32xf32> to vector<1x32xf32>
    %cst_6 = arith.constant 8.000000e+00 : f32
    %8 = vector.broadcast %cst_6 : f32 to vector<1x32xf32>
    %9 = arith.divf %7, %8 : vector<1x32xf32>
    %10 = vector.broadcast %9 : vector<1x32xf32> to vector<8x32xf32>
    %11 = arith.subf %5, %10 : vector<8x32xf32>
    %12 = arith.mulf %11, %11 : vector<8x32xf32>
    %cst_7 = arith.constant dense<0.000000e+00> : vector<32xf32>
    %13 = vector.multi_reduction <add>, %12, %cst_7 [0] : vector<8x32xf32> to vector<32xf32>
    %14 = vector.shape_cast %13 : vector<32xf32> to vector<1x32xf32>
    %cst_8 = arith.constant 8.000000e+00 : f32
    %15 = vector.broadcast %cst_8 : f32 to vector<1x32xf32>
    %16 = arith.divf %14, %15 : vector<1x32xf32>
    %c0_9 = arith.constant 0 : index
    %c0_10 = arith.constant 0 : index
    %17 = vector.load %arg3[%c0_9, %c0_10] : memref<1x32xf32, #tpu.memory_space<vmem>>, vector<1x32xf32>
    %cst_11 = arith.constant 9.99999974E-6 : f32
    %18 = vector.broadcast %cst_11 : f32 to vector<1x32xf32>
    %19 = arith.addf %16, %18 : vector<1x32xf32>
    %20 = math.rsqrt %19 : vector<1x32xf32>
    %21 = arith.mulf %17, %20 : vector<1x32xf32>
    %22 = vector.broadcast %21 : vector<1x32xf32> to vector<8x32xf32>
    %23 = arith.mulf %11, %22 : vector<8x32xf32>
    %c0_12 = arith.constant 0 : index
    %c0_13 = arith.constant 0 : index
    %24 = vector.load %arg4[%c0_12, %c0_13] : memref<1x32xf32, #tpu.memory_space<vmem>>, vector<1x32xf32>
    %25 = vector.broadcast %24 : vector<1x32xf32> to vector<8x32xf32>
    %26 = arith.addf %23, %25 : vector<8x32xf32>
    %cst_14 = arith.constant 0.000000e+00 : f32
    %27 = vector.broadcast %cst_14 : f32 to vector<8x32xf32>
    %28 = arith.maximumf %26, %27 : vector<8x32xf32>
    %c0_15 = arith.constant 0 : index
    %c0_16 = arith.constant 0 : index
    %29 = vector.load %arg5[%c0_15, %c0_16] : memref<8x64xf32, #tpu.memory_space<vmem>>, vector<8x32xf32>
    tpu.vector_store %arg5[%c0_15, %c0_16], %28 {strides = array<i32>} : memref<8x64xf32, #tpu.memory_space<vmem>>, vector<8x32xf32>,
    %c0_17 = arith.constant 0 : index
    %c32 = arith.constant 32 : index
    %30 = vector.load %arg5[%c0_17, %c32] : memref<8x64xf32, #tpu.memory_space<vmem>>, vector<8x32xf32>
    tpu.vector_store %arg5[%c0_17, %c32], %0 {strides = array<i32>} : memref<8x64xf32, #tpu.memory_space<vmem>>, vector<8x32xf32>,
    return
  }
}

</mosaic_0001>

<bundles_post_ra>
// kernel: tpu_custom_call.1
= control target key start
LH: loop header
LB: loop body
LE: loop exit
PB: predicated region body
PF: predicated region fallthrough
CT: control target
= control target key end

     0   :  { %10 = vsyncpa [#allocation3], 0  ;;  %s397_s0 = inlined_call_operand.hbm [shape: f32[8,32], index: 0, kind: input, shape index: {}]   ;;  %s398_s1 = inlined_call_operand.hbm [shape: f32[32,32], index: 1, kind: input, shape index: {}]   ;;  %s399_s2 = inlined_call_operand.vmem [shape: f32[1,32], index: 2, kind: input, shape index: {}]   ;;  %s400_s3 = inlined_call_operand.vmem [shape: f32[1,32], index: 3, kind: input, shape index: {}]   ;;  %s401_s4 = inlined_call_operand.vmem [shape: f32[1,32], index: 4, kind: input, shape index: {}]   ;;  %s402_s5 = inlined_call_operand.hbm [shape: f32[8,64], index: 5, kind: output, shape index: {}]  }
   0x1   :  { %11 = vsyncpa [#allocation6], 0 }
   0x2   :  { %12 = vsyncpa [#allocation4], 0  ;;  %s302_s18 = smov [#allocation2]   ;;  %s303_s20 = smov [#allocation5]  }
   0x3   :  { %s19_s19 = sshll.u32 %s302_s18, 4  ;;  %s28_s21 = sshll.u32 %s303_s20, 4  ;;  %s20_s19 = int_to_ptr.vmem [resolvable:$true] %s19_s19  ;;  %s341_s21 = int_to_ptr.vmem [resolvable:$true] %s28_s21 }
   0x4   :  { %s230_s24 = scalar_lea.hbm %s397_s0, 128 }
   0x5   :  { %p231_p0 = scmp.ne.s32.totalorder %s397_s0, %s230_s24  ;;  %p234_p1 = scmp.lt.u32.totalorder %s230_s24, %s397_s0 }
   0x7   :  { %p236_p2 = pnand %p234_p1, %p231_p0 }
   0x9   :  { %239 = shalt.err (!%p236_p2)
}
   0xa   :  { %s240_s29 = scalar_lea.vmem %s20_s19, 128  ;;  %p245_p4 = scmp.lt.s32.totalorder %s20_s19, %s20_s19 }
   0xb   :  { %p241_p3 = scmp.ne.s32.totalorder %s20_s19, %s240_s29  ;;  %p246_p5 = scmp.lt.s32.totalorder %s240_s29, %s240_s29 }
   0xd   :  { %p247_p6 = por %p246_p5, %p245_p4 }
   0xf   :  { %p248_p7 = pnand %p247_p6, %p241_p3 }
  0x11   :  { %251 = shalt.err (!%p248_p7)
}
  0x12   :  { %22 = dma.hbm_to_vmem [thread:$0]  %s397_s0, 128, %s20_s19, [#allocation3]  }
  0x13   :  { %s252_s9 = scalar_lea.hbm %s398_s1, 512 }
  0x14   :  { %p253_p8 = scmp.ne.s32.totalorder %s398_s1, %s252_s9  ;;  %p256_p9 = scmp.lt.u32.totalorder %s252_s9, %s398_s1 }
  0x16   :  { %p258_p10 = pnand %p256_p9, %p253_p8 }
  0x18   :  { %261 = shalt.err (!%p258_p10)
}
  0x19   :  { %s262_s14 = scalar_lea.vmem %s341_s21, 512  ;;  %p267_p12 = scmp.lt.s32.totalorder %s341_s21, %s341_s21 }
  0x1a   :  { %p263_p11 = scmp.ne.s32.totalorder %s341_s21, %s262_s14  ;;  %p268_p13 = scmp.lt.s32.totalorder %s262_s14, %s262_s14 }
  0x1c   :  { %p269_p0 = por %p268_p13, %p267_p12 }
  0x1e   :  { %p270_p1 = pnand %p269_p0, %p263_p11 }
  0x20   :  { %273 = shalt.err (!%p270_p1)
}
  0x21   :  { %s304_s0 = smov 128   ;;  %s305_s15 = smov 8  }
  0x22   :  { %34 = dma.hbm_to_vmem [thread:$0]  %s398_s1, 512, %s341_s21, [#allocation6], %s304_s0, %s304_s0, %s305_s15  }
  0x23   :  { %296 = dma.done.wait [#allocation3], 128  }
  0x24   :  { %297 = vsyncadd [#allocation3], 4294967168 }
  0x25   :  { %298 = dma.done.wait [#allocation6], 512  }
  0x26   :  { %299 = vsyncadd [#allocation6], 4294966784  ;;  %v306_v0 = vmov 0.0|0.0   ;;  %vm307_vm0 = vmmov 0   ;;  %v308_v1 = vmov 0.0   ;;  %v48_v2 = vld [vmem:[#allocation5] sm:$0xff]  ;;  %v157_v32 = vlaneseq }
  0x27   :  { %213 = vmatprep.subr.bf16.mxu0 %v306_v0  ;;  %210 = vmatprep.mubr.msk.f32.mxu0 %vm307_vm0, %v308_v1  ;;  %v49_v3 = vld [vmem:[#allocation5 + $0x8] sm:$0xff]  ;;  %v50_v4 = vld [vmem:[#allocation5 + $0x10] sm:$0xff]  ;;  %v51_v6 = vld [vmem:[#allocation5 + $0x18] sm:$0xff]  ;;  %s309_s18 = smov 32   ;;  %vm59_vm1 = vcmask 261120   ;;  %s310_s23 = smov [#allocation7]  }
  0x28   :  { %v214_v5 = vpack.c.bf16 %v49_v3, %v48_v2  ;;  %v47_v7 = vld [vmem:[#allocation2] sm:$0xff]  ;;  %v217_v8 = vpack.c.bf16 %v51_v6, %v50_v4  ;;  %v158_v33 = vshrl.u32 %v157_v32, 7  ;;  %s184_s24 = sshll.u32 %s310_s23, 4  ;;  %vm176_vm2 = vcmask 523520   ;;  %s185_s24 = int_to_ptr.vmem [resolvable:$true] %s184_s24 }
  0x29   :  { %173 = vrot.lane.b32.xlu0 %v47_v7, %s309_s18  ;;  %v194_v9 = vld [vmem:[%s399_s2] ss:$0 sm:$0xff]  ;;  %p279_p3 = scmp.lt.s32.totalorder %s185_s24, %s185_s24 }
  0x2a   :  { %215 = vmatpush3.bf16.msra.mxu0 %v214_v5  ;;  %v152_v34 = vld [vmem:[%s400_s3] sm:$0x1]  ;;  %v159_v35 = vsub.s32 0, %v158_v33  ;;  %s274_s3 = scalar_lea.vmem %s185_s24, 128 }
  0x2b   :  { %216 = vmatprep.subr.bf16.mxu0 %v306_v0  ;;  %v196_v39 = vld [vmem:[%s401_s4] ss:$0 sm:$0xff]  ;;  %p275_p2 = scmp.ne.s32.totalorder %s185_s24, %s274_s3  ;;  %p280_p4 = scmp.lt.s32.totalorder %s274_s3, %s274_s3 }
  0x2d   :  { %p281_p5 = por %p280_p4, %p279_p3 }
  0x2e   :  { %218 = vmatpush3.bf16.msra.mxu0 %v217_v8 }
  0x2f   :  { %p282_p6 = pnand %p281_p5, %p275_p2 }
  0x31   :  { %211 = vmatmul.mubr.msk.f32.vlgmr.msra.gmra.mrb[0].mxu0 %vm59_vm1, %v47_v7 }
  0x9b   :  { %v174_v43 = vpop.permute.xlu0 %173 }
 0x104   :  { %v129_v10 = vpop.f32.mrb[0].mxu0 }
 0x105   :  { %v130_v11 = vadd.f32 %v194_v9, %v129_v10  ;;  %v212_v12 = vpop.f32.mrb[1].mxu0 }
 0x107   :  { %v133_v13 = vsel %vm59_vm1, %v130_v11, 0.0 }
 0x108   :  { %v134_v14 = vrot.slane %v133_v13, 4 }
 0x10a   :  { %v135_v15 = vadd.f32 %v134_v14, %v133_v13 }
 0x10c   :  { %v136_v16 = vrot.slane %v135_v15, 2 }
 0x10e   :  { %v137_v17 = vadd.f32 %v136_v16, %v135_v15 }
 0x110   :  { %v138_v18 = vrot.slane %v137_v17, 1 }
 0x112   :  { %v139_v19 = vadd.f32 %v138_v18, %v137_v17 }
 0x114   :  { %v141_v20 = vmul.f32 0.125, %v139_v19 }
 0x116   :  { %v142_v21 = vsub.f32 %v130_v11, %v141_v20 }
 0x118   :  { %v143_v22 = vmul.f32 %v142_v21, %v142_v21 }
 0x11a   :  { %v144_v23 = vsel %vm59_vm1, %v143_v22, 0.0 }
 0x11b   :  { %v145_v24 = vrot.slane %v144_v23, 4 }
 0x11d   :  { %v146_v25 = vadd.f32 %v145_v24, %v144_v23 }
 0x11f   :  { %v147_v26 = vrot.slane %v146_v25, 2 }
 0x121   :  { %v148_v27 = vadd.f32 %v147_v26, %v146_v25 }
 0x123   :  { %v149_v28 = vrot.slane %v148_v27, 1 }
 0x125   :  { %v150_v29 = vadd.f32 %v149_v28, %v148_v27 }
 0x127   :  { %v151_v30 = vmul.f32 0.125, %v150_v29 }
 0x129   :  { %v153_v31 = vadd.f32 1e-05, %v151_v30 }
 0x12b   :  { %228 = vrsqrt.f32 %v153_v31 }
 0x135   :  { %v229_v36 = vpop.eup %228 }
 0x136   :  { %v155_v37 = vmul.f32 %v229_v36, %v152_v34 }
 0x138   :  { %v160_v38 = vrot.slane %v155_v37, %v159_v35 }
 0x13a   :  { %v162_v40 = vmul.f32 %v160_v38, %v142_v21 }
 0x13c   :  { %v170_v41 = vadd.f32 %v196_v39, %v162_v40 }
 0x13e   :  { %v171_v42 = vmax.f32 %v170_v41, 0.0 }
 0x140   :  { %172 = vst.msk [vmem:[#allocation7] sm:$0xff] %vm59_vm1, %v171_v42 }
 0x141   :  { %177 = vst.msk [vmem:[#allocation7] sm:$0xff] %vm176_vm2, %v174_v43 }
 0x142   :  { %285 = shalt.err (!%p282_p6)
}
 0x143   :  { %s286_s26 = scalar_lea.hbm %s402_s5, 128 }
 0x144   :  { %p287_p7 = scmp.ne.s32.totalorder %s402_s5, %s286_s26  ;;  %p290_p8 = scmp.lt.u32.totalorder %s286_s26, %s402_s5 }
 0x146   :  { %p292_p9 = pnand %p290_p8, %p287_p7 }
 0x148   :  { %295 = shalt.err (!%p292_p9)
}
 0x149   :  { %187 = dma.vmem_to_hbm [thread:$0]  %s185_s24, 128, %s402_s5, [#allocation4]  }
 0x14a   :  { %300 = dma.done.wait [#allocation4], 128  }
 0x14b   :  { %301 = vsyncadd [#allocation4], 4294967168 }
 0x14c   :  { %191 = vsyncpa [#allocation3], 1 }
 0x14d   :  { %192 = vsyncpa [#allocation6], 1 }
 0x14e   :  { %193 = vsyncpa [#allocation4], 1 }

</bundles_post_ra>
